<compile_context>
chip_gen: v7x
topology: tpu7x:2x2x1
jax: 0.10.0
libtpu: 0.0.40
codegen_flags: <defaults>
</compile_context>

<pallas_src>
import collections
import math

import jax
import jax.numpy as jnp
from jax.experimental import pallas as pl
from jax.experimental.pallas import tpu as pltpu


def _round_up(x, m):
    return ((x + m - 1) // m) * m


# ----------------------------------------------------------------------------
# Fused kernel (per M-tile):
#   h = tanh( sum_i x_i @ W_i + b )          [TM, 2H]   (actor half | critic half)
#   v = sum(h * wcl_pad, -1) + bcl           [TM, 1]    (wcl_pad zero on actor half)
# ----------------------------------------------------------------------------
def _make_mlp_base_kernel(n_obs):
    def kernel(*refs):
        x_refs = refs[:n_obs]
        w_refs = refs[n_obs:2 * n_obs]
        b_ref, wclp_ref, bcl_ref, h_ref, v_ref = refs[2 * n_obs:]

        # One bf16 MXU matmul per observation stream, accumulated in f32.
        # x is read f32 from HBM and cast here (no extra HBM round-trip).
        acc = jnp.dot(x_refs[0][...].astype(jnp.bfloat16), w_refs[0][...],
                      preferred_element_type=jnp.float32)
        for i in range(1, n_obs):
            acc = acc + jnp.dot(x_refs[i][...].astype(jnp.bfloat16), w_refs[i][...],
                                preferred_element_type=jnp.float32)

        h = jnp.tanh(acc + b_ref[...])                                   # f32, EUP
        # critic_linear folded in: wcl_pad is zero over the actor half, so this
        # equals critic_hidden @ w_cl with no in-kernel slicing.
        v = jnp.sum(h * wclp_ref[...], axis=-1, keepdims=True) + bcl_ref[...]

        h_ref[...] = h.astype(h_ref.dtype)       # lane-dense bf16 store
        v_ref[...] = v                           # tiny f32 column
    return kernel


def fused_mlp_base(x_list, w_chunks, b_pack, wcl_pad, bcl, *, hidden_size,
                   max_tile_m=1024):
    """x_list: list of [B, K_i] f32 -> (value [B,1] f32, hidden_actor [B,H] bf16)."""
    B = x_list[0].shape[0]
    k_sizes = [int(x.shape[1]) for x in x_list]
    N = 2 * hidden_size
    # NOTE: lane-dense (unmasked) stores assume 2*hidden_size is a multiple of 128
    # (true for the module default hidden_size=64); other H still compile (block
    # equals the full array dim) but use masked partial stores.

    # Tile the batch so there are ~4+ grid steps (DMA/compute overlap, v7x
    # megacore) without exceeding max_tile_m.  Small batches: one full-array
    # block (no padding, no ragged overhang).  Large batches: sublane-multiple
    # tiles with a ragged last block (out-of-range rows are never written back).
    target_tm = min(max_tile_m, max(16, _round_up(pl.cdiv(B, 4), 16)))
    TM = B if B <= target_tm else target_tm
    grid_m = pl.cdiv(B, TM)

    in_specs = (
        [pl.BlockSpec((TM, k), lambda i: (i, 0)) for k in k_sizes]      # x_i, M-tiled
        + [pl.BlockSpec((k, N), lambda i: (0, 0)) for k in k_sizes]     # W_i chunks
        + [pl.BlockSpec((1, N), lambda i: (0, 0)),                      # packed bias
           pl.BlockSpec((1, N), lambda i: (0, 0)),                      # padded w_cl
           pl.BlockSpec((1, 1), lambda i: (0, 0))]                      # b_cl
    )

    h_all, value = pl.pallas_call(
        _make_mlp_base_kernel(len(x_list)),
        out_shape=(
            jax.ShapeDtypeStruct((B, N), jnp.bfloat16),   # bf16 writeback (half bytes)
            jax.ShapeDtypeStruct((B, 1), jnp.float32),
        ),
        grid=(grid_m,),
        in_specs=in_specs,
        out_specs=(
            pl.BlockSpec((TM, N), lambda i: (i, 0)),
            pl.BlockSpec((TM, 1), lambda i: (i, 0)),
        ),
        compiler_params=pltpu.CompilerParams(
            dimension_semantics=("parallel",),             # pipeline / megacore over M
            vmem_limit_bytes=32 * 1024 * 1024,             # safe on v5e/v6e/v7x
        ),
    )(*x_list, *w_chunks, b_pack, wcl_pad, bcl)

    hidden_actor = h_all[:, :hidden_size]                  # actor half of the slab
    return value, hidden_actor


# ----------------------------------------------------------------------------
# Deterministic parameter construction (mirrors init_normc_ + zero bias)
# ----------------------------------------------------------------------------
def _normc_init(key, fan_in, fan_out):
    """init_normc_: normal(0,1), then normalize each output unit's weight vector."""
    w = jax.random.normal(key, (fan_in, fan_out), jnp.float32)
    return w / jnp.sqrt(jnp.sum(w * w, axis=0, keepdims=True))


def init_params(key, obs_sizes, hidden_size):
    num_inputs = sum(obs_sizes)
    k_a, k_c, k_cl = jax.random.split(key, 3)
    H = hidden_size
    w_actor = _normc_init(k_a, num_inputs, H)       # actor:  Linear(num_inputs, H)
    w_critic = _normc_init(k_c, num_inputs, H)      # critic: Linear(num_inputs, H)
    w_cl = _normc_init(k_cl, H, 1)                  # critic_linear: Linear(H, 1)

    # actor | critic packed along N so one MXU pass computes both heads; split
    # along K per observation stream so the kernel never needs a concatenated x.
    w_pack = jnp.concatenate([w_actor, w_critic], axis=1).astype(jnp.bfloat16)
    w_chunks, off = [], 0
    for k in obs_sizes:
        w_chunks.append(w_pack[off:off + k])
        off += k

    params = dict(
        w_chunks=tuple(w_chunks),
        b_pack=jnp.zeros((1, 2 * H), jnp.float32),  # biases init to 0
        # critic_linear weight, zero over the actor half -> in-kernel reduction
        wcl_pad=jnp.concatenate(
            [jnp.zeros((H,), jnp.float32), w_cl[:, 0]]).reshape(1, 2 * H),
        bcl=jnp.zeros((1, 1), jnp.float32),
        # f32 copies kept only for the pure-JAX reference check below
        _w_actor=w_actor, _w_critic=w_critic, _w_cl=w_cl,
    )
    return params


# ----------------------------------------------------------------------------
# FlattenMLPBase.forward (non-recurrent, use_critic=True)
# ----------------------------------------------------------------------------
def flatten_mlp_base_forward(params, inputs, rnn_hxs=None, masks=None, *,
                             obs_keys, hidden_size):
    """Returns (value, hidden_actor, rnn_hxs), matching the PyTorch module.

    critic_detach only matters for gradients; the forward pass is identical.
    """
    # Per-obs flatten is a free contiguous reshape; the concat is eliminated —
    # each stream feeds the fused kernel directly.
    x_list = [inputs[k].reshape(inputs[k].shape[0], -1) for k in obs_keys]

    # TODO(synk): the recurrent GRU branch (_forward_gru) is not implemented;
    # this module is instantiated with recurrent=False, so rnn_hxs passes through.
    value, hidden_actor = fused_mlp_base(
        x_list, params["w_chunks"], params["b_pack"], params["wcl_pad"],
        params["bcl"], hidden_size=hidden_size)
    return value, hidden_actor, rnn_hxs


def _reference_forward(params, inputs, obs_keys):
    """Pure-JAX f32 reference."""
    flat = [inputs[k].reshape(inputs[k].shape[0], -1) for k in obs_keys]
    x = jnp.concatenate(flat, axis=1)
    ha = jnp.tanh(jnp.dot(x, params["_w_actor"]))
    hc = jnp.tanh(jnp.dot(x, params["_w_critic"]))
    v = jnp.dot(hc, params["_w_cl"])
    return v, ha


# ----------------------------------------------------------------------------
# Demo
# ----------------------------------------------------------------------------
if __name__ == "__main__":
    HIDDEN_SIZE = 64            # module default; 2*H = 128 -> lane-dense packed matmul
    B = 2
    obs_spaces = collections.OrderedDict(
        image=(4, 16, 16),
        state=(8,),
    )
    obs_keys = list(obs_spaces.keys())
    obs_sizes = [math.prod(s) for s in obs_spaces.values()]

    key = jax.random.PRNGKey(0)
    k_params, k_img, k_state = jax.random.split(key, 3)
    params = init_params(k_params, obs_sizes, HIDDEN_SIZE)

    inputs = {
        "image": jax.random.normal(k_img, (B,) + obs_spaces["image"], jnp.float32),
        "state": jax.random.normal(k_state, (B,) + obs_spaces["state"], jnp.float32),
    }
    rnn_hxs = jnp.zeros((B, 1), jnp.float32)    # recurrent_hidden_state_size == 1
    masks = jnp.ones((B, 1), jnp.float32)

    value, hidden_actor, rnn_hxs_out = flatten_mlp_base_forward(
        params, inputs, rnn_hxs, masks, obs_keys=obs_keys, hidden_size=HIDDEN_SIZE)
    jax.block_until_ready((value, hidden_actor, rnn_hxs_out))

    assert value.shape == (B, 1)
    assert hidden_actor.shape == (B, HIDDEN_SIZE)
    assert rnn_hxs_out.shape == (B, 1)

    v_ref, ha_ref = _reference_forward(params, inputs, obs_keys)
    assert jnp.allclose(value, v_ref, atol=2e-2, rtol=2e-2)
    assert jnp.allclose(hidden_actor.astype(jnp.float32), ha_ref, atol=2e-2, rtol=2e-2)

    print("KERNEL_OK")
</pallas_src>

<mosaic_0001>
module attributes {stable_mosaic.version = 11 : i64} {
  func.func @kernel(%arg0: i32, %arg1: memref<2x1024xf32, #tpu.memory_space<vmem>>, %arg2: memref<2x8xf32, #tpu.memory_space<vmem>>, %arg3: memref<1024x128xbf16, #tpu.memory_space<vmem>>, %arg4: memref<8x128xbf16, #tpu.memory_space<vmem>>, %arg5: memref<1x128xf32, #tpu.memory_space<vmem>>, %arg6: memref<1x128xf32, #tpu.memory_space<vmem>>, %arg7: memref<1x1xf32, #tpu.memory_space<vmem>>, %arg8: memref<2x128xbf16, #tpu.memory_space<vmem>>, %arg9: memref<2x1xf32, #tpu.memory_space<vmem>>) attributes {dimension_semantics = [#tpu.dimension_semantics<parallel>], iteration_bounds = array<i64: 1>, scalar_prefetch = 0 : i64, scratch_operands = 0 : i64, tpu.core_type = #tpu.core_type<tc>, window_params = [{transform_indices = @transform_0, window_bounds = array<i64: 2, 1024>}, {transform_indices = @transform_1, window_bounds = array<i64: 2, 8>}, {pipeline_mode = #tpu.pipeline_mode<synchronous>, transform_indices = @transform_2, window_bounds = array<i64: 1024, 128>}, {pipeline_mode = #tpu.pipeline_mode<synchronous>, transform_indices = @transform_3, window_bounds = array<i64: 8, 128>}, {pipeline_mode = #tpu.pipeline_mode<synchronous>, transform_indices = @transform_4, window_bounds = array<i64: 1, 128>}, {pipeline_mode = #tpu.pipeline_mode<synchronous>, transform_indices = @transform_5, window_bounds = array<i64: 1, 128>}, {pipeline_mode = #tpu.pipeline_mode<synchronous>, transform_indices = @transform_6, window_bounds = array<i64: 1, 1>}, {transform_indices = @transform_7, window_bounds = array<i64: 2, 128>}, {transform_indices = @transform_8, window_bounds = array<i64: 2, 1>}]} {
    %c0 = arith.constant 0 : index
    %c0_0 = arith.constant 0 : index
    %0 = vector.load %arg1[%c0, %c0_0] : memref<2x1024xf32, #tpu.memory_space<vmem>>, vector<2x1024xf32>
    %1 = arith.truncf %0 : vector<2x1024xf32> to vector<2x1024xbf16>
    %c0_1 = arith.constant 0 : index
    %c0_2 = arith.constant 0 : index
    %2 = vector.load %arg3[%c0_1, %c0_2] : memref<1024x128xbf16, #tpu.memory_space<vmem>>, vector<1024x128xbf16>
    %cst = arith.constant dense<0.000000e+00> : vector<2x128xf32>
    %3 = tpu.matmul %1, %2, %cst {dimension_numbers = #tpu.dot_dimension_numbers<[1], [0], [0], [1], [0, 0, 1, 1], [], []>} : vector<2x1024xbf16>, vector<1024x128xbf16>, vector<2x128xf32> -> vector<2x128xf32>
    %c0_3 = arith.constant 0 : index
    %c0_4 = arith.constant 0 : index
    %4 = vector.load %arg2[%c0_3, %c0_4] : memref<2x8xf32, #tpu.memory_space<vmem>>, vector<2x8xf32>
    %5 = arith.truncf %4 : vector<2x8xf32> to vector<2x8xbf16>
    %c0_5 = arith.constant 0 : index
    %c0_6 = arith.constant 0 : index
    %6 = vector.load %arg4[%c0_5, %c0_6] : memref<8x128xbf16, #tpu.memory_space<vmem>>, vector<8x128xbf16>
    %cst_7 = arith.constant dense<0.000000e+00> : vector<2x128xf32>
    %7 = tpu.matmul %5, %6, %cst_7 {dimension_numbers = #tpu.dot_dimension_numbers<[1], [0], [0], [1], [0, 0, 1, 1], [], []>} : vector<2x8xbf16>, vector<8x128xbf16>, vector<2x128xf32> -> vector<2x128xf32>
    %8 = arith.addf %3, %7 : vector<2x128xf32>
    %c0_8 = arith.constant 0 : index
    %c0_9 = arith.constant 0 : index
    %9 = vector.load %arg5[%c0_8, %c0_9] : memref<1x128xf32, #tpu.memory_space<vmem>>, vector<1x128xf32>
    %10 = vector.broadcast %9 : vector<1x128xf32> to vector<2x128xf32>
    %11 = arith.addf %8, %10 : vector<2x128xf32>
    %12 = math.tanh %11 : vector<2x128xf32>
    %c0_10 = arith.constant 0 : index
    %c0_11 = arith.constant 0 : index
    %13 = vector.load %arg6[%c0_10, %c0_11] : memref<1x128xf32, #tpu.memory_space<vmem>>, vector<1x128xf32>
    %14 = vector.broadcast %13 : vector<1x128xf32> to vector<2x128xf32>
    %15 = arith.mulf %12, %14 : vector<2x128xf32>
    %cst_12 = arith.constant dense<0.000000e+00> : vector<2xf32>
    %16 = vector.multi_reduction <add>, %15, %cst_12 [1] : vector<2x128xf32> to vector<2xf32>
    %17 = vector.shape_cast %16 : vector<2xf32> to vector<2x1xf32>
    %c0_13 = arith.constant 0 : index
    %c0_14 = arith.constant 0 : index
    %18 = vector.load %arg7[%c0_13, %c0_14] : memref<1x1xf32, #tpu.memory_space<vmem>>, vector<1x1xf32>
    %19 = vector.broadcast %18 : vector<1x1xf32> to vector<2x1xf32>
    %20 = arith.addf %17, %19 : vector<2x1xf32>
    %21 = arith.truncf %12 : vector<2x128xf32> to vector<2x128xbf16>
    %c0_15 = arith.constant 0 : index
    %c0_16 = arith.constant 0 : index
    %22 = vector.load %arg8[%c0_15, %c0_16] : memref<2x128xbf16, #tpu.memory_space<vmem>>, vector<2x128xbf16>
    tpu.vector_store %arg8[%c0_15, %c0_16], %21 {strides = array<i32>} : memref<2x128xbf16, #tpu.memory_space<vmem>>, vector<2x128xbf16>,
    %c0_17 = arith.constant 0 : index
    %c0_18 = arith.constant 0 : index
    %23 = vector.load %arg9[%c0_17, %c0_18] : memref<2x1xf32, #tpu.memory_space<vmem>>, vector<2x1xf32>
    tpu.vector_store %arg9[%c0_17, %c0_18], %20 {strides = array<i32>} : memref<2x1xf32, #tpu.memory_space<vmem>>, vector<2x1xf32>,
    return
  }
  func.func @transform_0(%arg0: i32) -> (i32, i32) {
    %c0_i32 = arith.constant 0 : i32
    %c0_i32_0 = arith.constant 0 : i32
    return %arg0, %c0_i32 : i32, i32
  }
  func.func @transform_1(%arg0: i32) -> (i32, i32) {
    %c0_i32 = arith.constant 0 : i32
    %c0_i32_0 = arith.constant 0 : i32
    return %arg0, %c0_i32 : i32, i32
  }
  func.func @transform_2(%arg0: i32) -> (i32, i32) {
    %c0_i32 = arith.constant 0 : i32
    %c0_i32_0 = arith.constant 0 : i32
    %c0_i32_1 = arith.constant 0 : i32
    return %c0_i32, %c0_i32_0 : i32, i32
  }
  func.func @transform_3(%arg0: i32) -> (i32, i32) {
    %c0_i32 = arith.constant 0 : i32
    %c0_i32_0 = arith.constant 0 : i32
    %c0_i32_1 = arith.constant 0 : i32
    return %c0_i32, %c0_i32_0 : i32, i32
  }
  func.func @transform_4(%arg0: i32) -> (i32, i32) {
    %c0_i32 = arith.constant 0 : i32
    %c0_i32_0 = arith.constant 0 : i32
    %c0_i32_1 = arith.constant 0 : i32
    return %c0_i32, %c0_i32_0 : i32, i32
  }
  func.func @transform_5(%arg0: i32) -> (i32, i32) {
    %c0_i32 = arith.constant 0 : i32
    %c0_i32_0 = arith.constant 0 : i32
    %c0_i32_1 = arith.constant 0 : i32
    return %c0_i32, %c0_i32_0 : i32, i32
  }
  func.func @transform_6(%arg0: i32) -> (i32, i32) {
    %c0_i32 = arith.constant 0 : i32
    %c0_i32_0 = arith.constant 0 : i32
    %c0_i32_1 = arith.constant 0 : i32
    return %c0_i32, %c0_i32_0 : i32, i32
  }
  func.func @transform_7(%arg0: i32) -> (i32, i32) {
    %c0_i32 = arith.constant 0 : i32
    %c0_i32_0 = arith.constant 0 : i32
    return %arg0, %c0_i32 : i32, i32
  }
  func.func @transform_8(%arg0: i32) -> (i32, i32) {
    %c0_i32 = arith.constant 0 : i32
    %c0_i32_0 = arith.constant 0 : i32
    return %arg0, %c0_i32 : i32, i32
  }
}

</mosaic_0001>

<bundles_post_ra>
// kernel: tpu_custom_call.1
= control target key start
LH: loop header
LB: loop body
LE: loop exit
PB: predicated region body
PF: predicated region fallthrough
CT: control target
= control target key end

     0   :  { %s1320_s0 = inlined_call_operand.hbm [shape: f32[2,1024], index: 0, kind: input, shape index: {}]   ;;  %s1321_s1 = inlined_call_operand.vmem [shape: f32[2,8], index: 1, kind: input, shape index: {}]   ;;  %s1322_s2 = inlined_call_operand.hbm [shape: bf16[1024,128], index: 2, kind: input, shape index: {}]   ;;  %s1323_s3 = inlined_call_operand.vmem [shape: bf16[8,128], index: 3, kind: input, shape index: {}]   ;;  %s1324_s4 = inlined_call_operand.vmem [shape: f32[1,128], index: 4, kind: input, shape index: {}]   ;;  %s1325_s5 = inlined_call_operand.vmem [shape: f32[1,128], index: 5, kind: input, shape index: {}]   ;;  %s1326_s6 = inlined_call_operand.<no memory space> [shape: f32[1,1], index: 6, kind: input, shape index: {}]   ;;  %s1327_s7 = inlined_call_operand.hbm [shape: bf16[2,128], index: 7, kind: output, shape index: {0}]   ;;  %s1328_s8 = inlined_call_operand.vmem [shape: f32[2,1], index: 8, kind: output, shape index: {1}]  }
   0x1   :  { %v14_v0 = vstv %s1326_s6 }
   0x2   :  { %15 = vst [vmem:[#allocation2] sm:$0x1] %v14_v0 }
   0x3   :  { %16 = vsyncpa [#allocation4], 0 }
   0x4   :  { %17 = vsyncpa [#allocation7], 0 }
   0x5   :  { %18 = vsyncpa [#allocation5], 0  ;;  %s1200_s29 = smov [#allocation3]   ;;  %s1201_s9 = smov [#allocation6]  }
   0x6   :  { %s25_s30 = sshll.u32 %s1200_s29, 4  ;;  %s36_s10 = sshll.u32 %s1201_s9, 4  ;;  %s26_s30 = int_to_ptr.vmem [resolvable:$true] %s25_s30  ;;  %s1256_s10 = int_to_ptr.vmem [resolvable:$true] %s36_s10 }
   0x7   :  { %s1128_s13 = scalar_lea.hbm %s1320_s0, 256 }
   0x8   :  { %p1129_p0 = scmp.ne.s32.totalorder %s1320_s0, %s1128_s13  ;;  %p1132_p1 = scmp.lt.u32.totalorder %s1128_s13, %s1320_s0 }
   0xa   :  { %p1134_p2 = pnand %p1132_p1, %p1129_p0 }
   0xc   :  { %1137 = shalt.err (!%p1134_p2)
}
   0xd   :  { %s1138_s17 = scalar_lea.vmem %s26_s30, 256  ;;  %p1143_p4 = scmp.lt.s32.totalorder %s26_s30, %s26_s30 }
   0xe   :  { %p1139_p3 = scmp.ne.s32.totalorder %s26_s30, %s1138_s17  ;;  %p1144_p5 = scmp.lt.s32.totalorder %s1138_s17, %s1138_s17 }
  0x10   :  { %p1145_p6 = por %p1144_p5, %p1143_p4 }
  0x12   :  { %p1146_p7 = pnand %p1145_p6, %p1139_p3 }
  0x14   :  { %1149 = shalt.err (!%p1146_p7)
}
  0x15   :  { %28 = dma.hbm_to_vmem [thread:$0]  %s1320_s0, 256, %s26_s30, [#allocation4]  }
  0x16   :  { %s1150_s22 = scalar_lea.hbm %s1322_s2, 8192 }
  0x17   :  { %p1151_p8 = scmp.ne.s32.totalorder %s1322_s2, %s1150_s22  ;;  %p1154_p9 = scmp.lt.u32.totalorder %s1150_s22, %s1322_s2 }
  0x19   :  { %p1156_p10 = pnand %p1154_p9, %p1151_p8 }
  0x1b   :  { %1159 = shalt.err (!%p1156_p10)
}
  0x1c   :  { %s1160_s27 = scalar_lea.vmem %s1256_s10, 8192  ;;  %p1165_p12 = scmp.lt.s32.totalorder %s1256_s10, %s1256_s10 }
  0x1d   :  { %p1161_p11 = scmp.ne.s32.totalorder %s1256_s10, %s1160_s27  ;;  %p1166_p13 = scmp.lt.s32.totalorder %s1160_s27, %s1160_s27 }
  0x1f   :  { %p1167_p0 = por %p1166_p13, %p1165_p12 }
  0x21   :  { %p1168_p1 = pnand %p1167_p0, %p1161_p11 }
  0x23   :  { %1171 = shalt.err (!%p1168_p1)
}
  0x24   :  { %s1202_s0 = smov 64   ;;  %s1203_s28 = smov 4  }
  0x25   :  { %42 = dma.hbm_to_vmem [thread:$0]  %s1322_s2, 8192, %s1256_s10, [#allocation7], %s1202_s0, %s1202_s0, %s1203_s28  }
  0x26   :  { %1194 = dma.done.wait [#allocation4], 256  }
  0x27   :  { %1195 = vsyncadd [#allocation4], 4294967040 }
  0x28   :  { %1196 = dma.done.wait [#allocation7], 8192  }
  0x29   :  { %1197 = vsyncadd [#allocation7], 4294959104  ;;  %v1204_v1 = vmov 0.0   ;;  %vm1205_vm0 = vmmov 0   ;;  %vm247_vm1 = vcmask 1043456   ;;  %v1060_v4 = vld [vmem:[#allocation6 + $0x40] sm:$0xff]   ;;  %v66_v28 = vlaneseq }
  0x2a   :  { %1046 = vmatprep.subr.bf16.mxu0 %v1204_v1  ;;  %1048 = vmatprep.mubr.msk.bf16.mxu0 %vm1205_vm0, %v1204_v1  ;;  %v242_v2 = vld [vmem:[%s1323_s3] sm:$0xf]  ;;  %v1061_v5 = vld [vmem:[#allocation6] sm:$0xff]   ;;  %vm243_vm2 = vcmask 64512   ;;  %v1072_v18 = vld [vmem:[#allocation6 + $0x58] sm:$0xff]   ;;  %vm852_vm3 = vcmask 1041408  }
  0x2b   :  { %v249_v3 = vsel %vm247_vm1, %v242_v2, 0  ;;  %v240_v6 = vld [vmem:[%s1321_s1] sm:$0x3]  ;;  %958 = vmatprep.subr.bf16.mxu1 %v1060_v4  ;;  %v1062_v8 = vld [vmem:[#allocation6 + $0xc0] sm:$0xff]   ;;  %v1073_v19 = vld [vmem:[#allocation6 + $0x18] sm:$0xff]   ;;  %v67_v34 = vshrl.u32 %v66_v28, 7 }
  0x2c   :  { %1047 = vmatpush3.bf16.msra.mxu0 %v249_v3  ;;  %v241_v7 = vpack.c.bf16 %v240_v6, %v240_v6  ;;  %959 = vmatpush3.bf16.msra.mxu1 %v1061_v5  ;;  %v1063_v9 = vld [vmem:[#allocation6 + $0x80] sm:$0xff]   ;;  %v1064_v10 = vld [vmem:[#allocation6 + $0x48] sm:$0xff]   ;;  %v1068_v14 = vld [vmem:[#allocation6 + $0x50] sm:$0xff]   ;;  %v1206_v26 = vmov 1983009808   ;;  %s1207_s14 = smov [#allocation8]  }
  0x2d   :  { %980 = vmatprep.subr.bf16.mxu0 %v1062_v8  ;;  %v1065_v11 = vld [vmem:[#allocation6 + $0x8] sm:$0xff]   ;;  %960 = vmatprep.subr.bf16.mxu1 %v1064_v10  ;;  %v1069_v15 = vld [vmem:[#allocation6 + $0x10] sm:$0xff]   ;;  %v1074_v20 = vld [vmem:[#allocation6 + $0xd8] sm:$0xff]   ;;  %v64_v27 = vunpack.c.l.s4 %v1206_v26  ;;  %s874_s15 = sshll.u32 %s1207_s14, 4  ;;  %s875_s15 = int_to_ptr.vmem [resolvable:$true] %s874_s15 }
  0x2e   :  { %v1066_v12 = vld [vmem:[#allocation6 + $0xc8] sm:$0xff]   ;;  %v1070_v16 = vld [vmem:[#allocation6 + $0xd0] sm:$0xff]   ;;  %v1075_v21 = vld [vmem:[#allocation6 + $0x98] sm:$0xff]   ;;  %s1172_s6 = scalar_lea.vmem %s875_s15, 16  ;;  %p1177_p3 = scmp.lt.s32.totalorder %s875_s15, %s875_s15 }
  0x2f   :  { %1049 = vmatmul.mubr.msk.bf16.vlgmr.msra.gmra.mrb[0].mxu0 %vm243_vm2, %v241_v7  ;;  %v1067_v13 = vld [vmem:[#allocation6 + $0x88] sm:$0xff]   ;;  %v1071_v17 = vld [vmem:[#allocation6 + $0x90] sm:$0xff]   ;;  %v1076_v22 = vld [vmem:[#allocation6 + $0x60] sm:$0xff]   ;;  %v65_v33 = vunpack.c.0.s8 %v64_v27  ;;  %p1173_p2 = scmp.ne.s32.totalorder %s875_s15, %s1172_s6 }
  0x30   :  { %981 = vmatpush3.bf16.msra.mxu0 %v1063_v9  ;;  %961 = vmatpush3.bf16.msra.mxu1 %v1065_v11  ;;  %v1077_v23 = vld [vmem:[#allocation6 + $0x20] sm:$0xff]   ;;  %v1080_v29 = vld [vmem:[#allocation6 + $0x68] sm:$0xff]   ;;  %v1084_v35 = vld [vmem:[#allocation6 + $0x70] sm:$0xff]  }
  0x31   :  { %982 = vmatprep.subr.bf16.mxu0 %v1066_v12  ;;  %962 = vmatprep.subr.bf16.mxu1 %v1068_v14  ;;  %v1078_v24 = vld [vmem:[#allocation6 + $0xe0] sm:$0xff]   ;;  %v1081_v30 = vld [vmem:[#allocation6 + $0x28] sm:$0xff]   ;;  %v1085_v36 = vld [vmem:[#allocation6 + $0x30] sm:$0xff]   ;;  %v1293_v39 = vsub.s32 %v65_v33, %v67_v34 }
  0x32   :  { %v1079_v25 = vld [vmem:[#allocation6 + $0xa0] sm:$0xff]   ;;  %v1082_v31 = vld [vmem:[#allocation6 + $0xe8] sm:$0xff]   ;;  %v1086_v37 = vld [vmem:[#allocation6 + $0xf0] sm:$0xff]  }
  0x33   :  { %v1083_v32 = vld [vmem:[#allocation6 + $0xa8] sm:$0xff]   ;;  %v1087_v38 = vld [vmem:[#allocation6 + $0xb0] sm:$0xff]   ;;  %v1088_v40 = vld [vmem:[#allocation6 + $0x78] sm:$0xff]  }
  0x34   :  { %983 = vmatpush3.bf16.msra.mxu0 %v1067_v13  ;;  %963 = vmatpush3.bf16.msra.mxu1 %v1069_v15  ;;  %v1089_v41 = vld [vmem:[#allocation6 + $0x38] sm:$0xff]   ;;  %v58_v43 = vld [vmem:[#allocation3] sm:$0xff]  ;;  %v1093_v47 = vld [vmem:[#allocation6 + $0x140] sm:$0xff]  }
  0x35   :  { %984 = vmatprep.subr.bf16.mxu0 %v1070_v16  ;;  %964 = vmatprep.subr.bf16.mxu1 %v1072_v18  ;;  %v1090_v42 = vld [vmem:[#allocation6 + $0xf8] sm:$0xff]   ;;  %v62_v44 = vcombine.high %v58_v43, %v58_v43  ;;  %v69_v45 = vrot.slane %v58_v43, %v1293_v39  ;;  %v1094_v50 = vld [vmem:[#allocation6 + $0x100] sm:$0xff]   ;;  %v1097_v57 = vld [vmem:[#allocation6 + $0x148] sm:$0xff]  }
  0x36   :  { %v1092_v46 = vld [vmem:[#allocation6 + $0xb8] sm:$0xff]   ;;  %v1095_v52 = vld [vmem:[#allocation6 + $0x1c0] sm:$0xff]   ;;  %v1098_v59 = vld [vmem:[#allocation6 + $0x108] sm:$0xff]  }
  0x37   :  { %v77_v48 = vcombine.high %v69_v45, %v69_v45  ;;  %v76_v49 = vrot.slane %v62_v44, %v1293_v39  ;;  %v104_v51 = vpack.c.bf16 %v69_v45, %v69_v45  ;;  %v1096_v55 = vld [vmem:[#allocation6 + $0x180] sm:$0xff]   ;;  %v1099_v60 = vld [vmem:[#allocation6 + $0x1c8] sm:$0xff]   ;;  %v1101_v62 = vld [vmem:[#allocation6 + $0x150] sm:$0xff]  }
  0x38   :  { %985 = vmatpush3.bf16.msra.mxu0 %v1071_v17  ;;  %965 = vmatpush3.bf16.msra.mxu1 %v1073_v19  ;;  %v1100_v61 = vld [vmem:[#allocation6 + $0x188] sm:$0xff]   ;;  %v1102_v63 = vld [vmem:[#allocation6 + $0x110] sm:$0xff]   ;;  %v1105_v2 = vld [vmem:[#allocation6 + $0x158] sm:$0xff]  }
  0x39   :  { %986 = vmatprep.subr.bf16.mxu0 %v1074_v20  ;;  %966 = vmatprep.subr.bf16.mxu1 %v1076_v22  ;;  %v105_v53 = vpack.c.bf16 %v77_v48, %v77_v48  ;;  %v78_v54 = vcombine.high %v76_v49, %v76_v49  ;;  %v106_v56 = vpack.c.bf16 %v76_v49, %v76_v49  ;;  %v1103_v0 = vld [vmem:[#allocation6 + $0x1d0] sm:$0xff]   ;;  %v1106_v3 = vld [vmem:[#allocation6 + $0x118] sm:$0xff]   ;;  %v1109_v6 = vld [vmem:[#allocation6 + $0x160] sm:$0xff]  }
  0x3a   :  { %v1104_v1 = vld [vmem:[#allocation6 + $0x190] sm:$0xff]   ;;  %v1107_v4 = vld [vmem:[#allocation6 + $0x1d8] sm:$0xff]   ;;  %v1110_v7 = vld [vmem:[#allocation6 + $0x120] sm:$0xff]  }
  0x3b   :  { %707 = vmatprep.mubr.bf16.mxu1 %v105_v53  ;;  %v107_v58 = vpack.c.bf16 %v78_v54, %v78_v54  ;;  %v1108_v5 = vld [vmem:[#allocation6 + $0x198] sm:$0xff]   ;;  %v1111_v8 = vld [vmem:[#allocation6 + $0x1e0] sm:$0xff]   ;;  %v1113_v10 = vld [vmem:[#allocation6 + $0x168] sm:$0xff]  }
  0x3c   :  { %987 = vmatpush3.bf16.msra.mxu0 %v1075_v21  ;;  %967 = vmatpush3.bf16.msra.mxu1 %v1077_v23  ;;  %v1112_v9 = vld [vmem:[#allocation6 + $0x1a0] sm:$0xff]   ;;  %v1114_v11 = vld [vmem:[#allocation6 + $0x128] sm:$0xff]   ;;  %v1117_v14 = vld [vmem:[#allocation6 + $0x170] sm:$0xff]  }
  0x3d   :  { %988 = vmatprep.subr.bf16.mxu0 %v1078_v24  ;;  %968 = vmatprep.subr.bf16.mxu1 %v1080_v29  ;;  %v1115_v12 = vld [vmem:[#allocation6 + $0x1e8] sm:$0xff]   ;;  %v1118_v15 = vld [vmem:[#allocation6 + $0x130] sm:$0xff]   ;;  %v1121_v18 = vld [vmem:[#allocation6 + $0x178] sm:$0xff]  }
  0x3e   :  { %747 = vmatprep.mubr.bf16.mxu0 %v107_v58  ;;  %v1116_v13 = vld [vmem:[#allocation6 + $0x1a8] sm:$0xff]   ;;  %v1119_v16 = vld [vmem:[#allocation6 + $0x1f0] sm:$0xff]   ;;  %v1122_v19 = vld [vmem:[#allocation6 + $0x138] sm:$0xff]  }
  0x3f   :  { %v1120_v17 = vld [vmem:[#allocation6 + $0x1b0] sm:$0xff]   ;;  %v1123_v20 = vld [vmem:[#allocation6 + $0x1f8] sm:$0xff]   ;;  %v953_v58 = vld [vmem:[%s1324_s4] ss:$0 sm:$0xff]  ;;  %s1176_s4 = scalar_lea.vmem %s875_s15, 32 }
  0x40   :  { %989 = vmatpush3.bf16.msra.mxu0 %v1079_v25  ;;  %969 = vmatpush3.bf16.msra.mxu1 %v1081_v30  ;;  %v59_v21 = vld [vmem:[#allocation3 + $0x8] sm:$0xff]  ;;  %p1178_p4 = scmp.lt.s32.totalorder %s1176_s4, %s1172_s6 }
  0x41   :  { %990 = vmatprep.subr.bf16.mxu0 %v1082_v31  ;;  %970 = vmatprep.subr.bf16.mxu1 %v1084_v35  ;;  %v86_v22 = vrot.slane %v59_v21, %v1293_v39  ;;  %v79_v23 = vcombine.high %v59_v21, %v59_v21  ;;  %v1124_v24 = vld [vmem:[#allocation6 + $0x1b8] sm:$0xff]  }
  0x42   :  { %p1179_p5 = por %p1178_p4, %p1177_p3 }
  0x43   :  { %v94_v25 = vcombine.high %v86_v22, %v86_v22  ;;  %v93_v26 = vrot.slane %v79_v23, %v1293_v39  ;;  %v108_v27 = vpack.c.bf16 %v86_v22, %v86_v22 }
  0x44   :  { %991 = vmatpush3.bf16.msra.mxu0 %v1083_v32  ;;  %971 = vmatpush3.bf16.msra.mxu1 %v1085_v36  ;;  %p1180_p6 = pnand %p1179_p5, %p1173_p2 }
  0x45   :  { %992 = vmatprep.subr.bf16.mxu0 %v1086_v37  ;;  %972 = vmatprep.subr.bf16.mxu1 %v1088_v40  ;;  %v109_v28 = vpack.c.bf16 %v94_v25, %v94_v25  ;;  %v95_v29 = vcombine.high %v93_v26, %v93_v26  ;;  %v110_v30 = vpack.c.bf16 %v93_v26, %v93_v26 }
  0x47   :  { %v111_v31 = vpack.c.bf16 %v95_v29, %v95_v29 }
  0x48   :  { %993 = vmatpush3.bf16.msra.mxu0 %v1087_v38  ;;  %973 = vmatpush3.bf16.msra.mxu1 %v1089_v41 }
  0x49   :  { %994 = vmatprep.subr.bf16.mxu0 %v1090_v42  ;;  %1002 = vmatprep.subr.bf16.mxu1 %v1093_v47 }
  0x4b   :  { %708 = vmatmul.mubr.bf16.vlgmr.msra.gmra.mrb[0].mxu1 %v104_v51 }
  0x4c   :  { %995 = vmatpush3.bf16.msra.mxu0 %v1092_v46  ;;  %1003 = vmatpush3.bf16.msra.mxu1 %v1094_v50 }
  0x4d   :  { %1024 = vmatprep.subr.bf16.mxu0 %v1095_v52  ;;  %1004 = vmatprep.subr.bf16.mxu1 %v1097_v57 }
  0x4e   :  { %787 = vmatprep.mubr.bf16.mxu1 %v109_v28 }
  0x4f   :  { %748 = vmatmul.mubr.bf16.vlgmr.msra.gmra.mrb[4].mxu0 %v106_v56 }
  0x50   :  { %1025 = vmatpush3.bf16.msra.mxu0 %v1096_v55  ;;  %1005 = vmatpush3.bf16.msra.mxu1 %v1098_v59 }
  0x51   :  { %1026 = vmatprep.subr.bf16.mxu0 %v1099_v60  ;;  %1006 = vmatprep.subr.bf16.mxu1 %v1101_v62  ;;  %v954_v62 = vld [vmem:[%s1325_s5] ss:$0 sm:$0xff] }
  0x52   :  { %827 = vmatprep.mubr.bf16.mxu0 %v111_v31 }
  0x54   :  { %1027 = vmatpush3.bf16.msra.mxu0 %v1100_v61  ;;  %1007 = vmatpush3.bf16.msra.mxu1 %v1102_v63 }
  0x55   :  { %1028 = vmatprep.subr.bf16.mxu0 %v1103_v0  ;;  %1008 = vmatprep.subr.bf16.mxu1 %v1105_v2 }
  0x58   :  { %1029 = vmatpush3.bf16.msra.mxu0 %v1104_v1  ;;  %1009 = vmatpush3.bf16.msra.mxu1 %v1106_v3 }
  0x59   :  { %1030 = vmatprep.subr.bf16.mxu0 %v1107_v4  ;;  %1010 = vmatprep.subr.bf16.mxu1 %v1109_v6 }
  0x5c   :  { %1031 = vmatpush3.bf16.msra.mxu0 %v1108_v5  ;;  %1011 = vmatpush3.bf16.msra.mxu1 %v1110_v7 }
  0x5d   :  { %1032 = vmatprep.subr.bf16.mxu0 %v1111_v8  ;;  %1012 = vmatprep.subr.bf16.mxu1 %v1113_v10 }
  0x60   :  { %1033 = vmatpush3.bf16.msra.mxu0 %v1112_v9  ;;  %1013 = vmatpush3.bf16.msra.mxu1 %v1114_v11 }
  0x61   :  { %1034 = vmatprep.subr.bf16.mxu0 %v1115_v12  ;;  %1014 = vmatprep.subr.bf16.mxu1 %v1117_v14 }
  0x64   :  { %1035 = vmatpush3.bf16.msra.mxu0 %v1116_v13  ;;  %1015 = vmatpush3.bf16.msra.mxu1 %v1118_v15 }
  0x65   :  { %1036 = vmatprep.subr.bf16.mxu0 %v1119_v16  ;;  %1016 = vmatprep.subr.bf16.mxu1 %v1121_v18 }
  0x68   :  { %1037 = vmatpush3.bf16.msra.mxu0 %v1120_v17  ;;  %1017 = vmatpush3.bf16.msra.mxu1 %v1122_v19 }
  0x69   :  { %1038 = vmatprep.subr.bf16.mxu0 %v1123_v20 }
  0x6b   :  { %788 = vmatmul.mubr.bf16.vlgmr.msra.gmra.mrb[4].mxu1 %v108_v27 }
  0x6c   :  { %1039 = vmatpush3.bf16.msra.mxu0 %v1124_v24 }
  0x6f   :  { %828 = vmatmul.mubr.bf16.vlgmr.msra.gmra.mrb[8].mxu0 %v110_v30 }
 0x102   :  { %v285_v32 = vpop.f32.mrb[0].mxu0 }
 0x103   :  { %v1050_v33 = vpop.f32.mrb[1].mxu0 }
 0x104   :  { %v288_v34 = vpop.f32.mrb[2].mxu0 }
 0x105   :  { %v1051_v35 = vpop.f32.mrb[3].mxu0 }
 0x11e   :  { %v974_v36 = vpop.f32.mrb[0].mxu1 }
 0x11f   :  { %v975_v37 = vpop.f32.mrb[1].mxu1 }
 0x120   :  { %v976_v38 = vadd.f32 %v975_v37, %v974_v36  ;;  %v977_v40 = vpop.f32.mrb[2].mxu1 }
 0x121   :  { %v978_v41 = vpop.f32.mrb[3].mxu1 }
 0x122   :  { %v996_v39 = vpop.f32.mrb[4].mxu0  ;;  %v710_v43 = vadd.f32 %v976_v38, %v285_v32 }
 0x123   :  { %v997_v42 = vpop.f32.mrb[5].mxu0 }
 0x124   :  { %v998_v44 = vadd.f32 %v997_v42, %v996_v39  ;;  %v999_v45 = vpop.f32.mrb[6].mxu0 }
 0x125   :  { %v1000_v46 = vpop.f32.mrb[7].mxu0 }
 0x126   :  { %v750_v47 = vadd.f32 %v998_v44, %v710_v43 }
 0x13e   :  { %v1018_v48 = vpop.f32.mrb[4].mxu1 }
 0x13f   :  { %v1019_v49 = vpop.f32.mrb[5].mxu1 }
 0x140   :  { %v1020_v50 = vadd.f32 %v1019_v49, %v1018_v48  ;;  %v1021_v51 = vpop.f32.mrb[6].mxu1 }
 0x141   :  { %v1022_v53 = vpop.f32.mrb[7].mxu1 }
 0x142   :  { %v1040_v52 = vpop.f32.mrb[8].mxu0  ;;  %v790_v55 = vadd.f32 %v1020_v50, %v750_v47 }
 0x143   :  { %v1041_v54 = vpop.f32.mrb[9].mxu0 }
 0x144   :  { %v1042_v56 = vadd.f32 %v1041_v54, %v1040_v52  ;;  %v1043_v57 = vpop.f32.mrb[10].mxu0 }
 0x145   :  { %v1044_v59 = vpop.f32.mrb[11].mxu0 }
 0x146   :  { %v830_v60 = vadd.f32 %v1042_v56, %v790_v55 }
 0x148   :  { %v842_v61 = vadd.f32 %v953_v58, %v830_v60 }
 0x14a   :  { %1126 = vtanh.f32 %v842_v61 }
 0x154   :  { %v1127_v63 = vpop.eup %1126 }
 0x155   :  { %v851_v0 = vmul.f32 %v1127_v63, %v954_v62  ;;  %v864_v1 = vpack.c.bf16 %v1127_v63, %v1127_v63 }
 0x157   :  { %v853_v2 = vsel %vm852_vm3, %v851_v0, 0.0  ;;  %865 = vst [vmem:[#allocation8] sm:$0x1] %v864_v1 }
 0x158   :  { %854 = vadd.xlane.f32.xlu0 %v853_v2 }
 0x159   :  { %1183 = shalt.err (!%p1180_p6)
}
 0x15a   :  { %s1184_s17 = scalar_lea.hbm %s1327_s7, 16 }
 0x15b   :  { %p1185_p7 = scmp.ne.s32.totalorder %s1327_s7, %s1184_s17  ;;  %p1188_p8 = scmp.lt.u32.totalorder %s1184_s17, %s1327_s7 }
 0x15d   :  { %p1190_p9 = pnand %p1188_p8, %p1185_p7 }
 0x15f   :  { %1193 = shalt.err (!%p1190_p9)
}
 0x160   :  { %877 = dma.vmem_to_hbm [thread:$0]  %s875_s15, 16, %s1327_s7, [#allocation5]   ;;  %v955_v3 = vld [vmem:[#allocation2] ss:$0 sm:$0xff]  ;;  %vm866_vm4 = vcmask 1024  }
 0x1e5   :  { %v855_v4 = vpop.xlane.xlu0 %854 }
 0x1e6   :  { %v863_v5 = vadd.f32 %v955_v3, %v855_v4 }
 0x1e8   :  { %867 = vst.msk [vmem:[%s1328_s8] sm:$0x3] %vm866_vm4, %v863_v5 }
 0x1e9   :  { %1198 = dma.done.wait [#allocation5], 16  }
 0x1ea   :  { %1199 = vsyncadd [#allocation5], 4294967280 }
 0x1eb   :  { %885 = vsyncpa [#allocation4], 1 }
 0x1ec   :  { %886 = vsyncpa [#allocation7], 1 }
 0x1ed   :  { %887 = vsyncpa [#allocation5], 1 }

</bundles_post_ra>
